<compile_context>
chip_gen: v7x
topology: tpu7x:2x2x1
jax: 0.10.0
libtpu: 0.0.40
codegen_flags: <defaults>
</compile_context>

<pallas_src>
import functools

import jax
import jax.numpy as jnp
from jax.experimental import pallas as pl
from jax.experimental.pallas import tpu as pltpu


SUBLANE = 8          # f32 sublane tile height (batch tile granularity)
MAX_TILE_B = 512     # rows per grid step: big streaming tiles -> HBM roofline


def _round_up(x, m):
    return (x + m - 1) // m * m


def _cdiv(a, b):
    return (a + b - 1) // b


def _device_kind():
    try:
        return jax.devices()[0].device_kind.lower()
    except Exception:
        return ""


@functools.lru_cache(maxsize=None)
def _mxu_is_256_wide():
    # v6e / v7x have 2x256x256 MXUs; v5e (and older) are 128-wide.
    k = _device_kind()
    return ("v6" in k) or ("v7" in k)


@functools.lru_cache(maxsize=None)
def _vmem_limit_bytes():
    """~75% of physical VMEM (leave headroom for compiler scratch/staging)."""
    cap = None
    try:
        cap = int(getattr(pltpu.get_tpu_info(), "vmem_capacity_bytes", 0)) or None
    except Exception:
        cap = None
    if cap is None:
        k = _device_kind()
        if "v7" in k:
            cap = 64 << 20          # v7x: 64 MiB per TensorCore
        elif k:
            cap = 128 << 20         # v5e / v6e: 128 MiB
        else:
            cap = 64 << 20          # unknown: be conservative
    return (cap * 3) // 4


def _feature_align(dim):
    """Lane alignment for a feature dim: 256 on 256-wide-MXU chips for large
    dims (fills the systolic array), 128 for tiny dims and on v5e."""
    if _mxu_is_256_wide() and dim >= 128:
        return _round_up(dim, 256)
    return _round_up(dim, 128)


def _bspec(shape, index_map, buffers=None):
    """BlockSpec, optionally with an explicit pipeline buffer count."""
    if buffers is not None:
        try:
            return pl.BlockSpec(shape, index_map,
                                pipeline_mode=pl.Buffered(buffers))
        except Exception:   # older JAX without pipeline_mode / Buffered
            pass
    return pl.BlockSpec(shape, index_map)


def _make_layer_stack_kernel(num_layers):
    """Fused kernel: num_layers x Layer.forward, each = ReLU(x @ W.T + b)."""

    def kernel(*refs):
        # refs = [x_ref, w0_ref, b0_ref, ..., w{L-1}_ref, b{L-1}_ref, o_ref]
        x_ref = refs[0]
        o_ref = refs[-1]
        h = x_ref[...]
        for i in range(num_layers):
            w_ref = refs[1 + 2 * i]                       # (in_pad, out_pad) bf16
            b_ref = refs[2 + 2 * i]                       # (1, out_pad) f32
            # MXU bf16 matmul with f32 accumulation.
            acc = jnp.dot(h.astype(jnp.bfloat16), w_ref[...],
                          preferred_element_type=jnp.float32)
            # Bias add + ReLU in f32 (VPU f32 path; v5e-safe).
            h = jnp.maximum(acc + b_ref[...], 0.0)        # == Layer.activation
            if i + 1 < num_layers:
                h = h.astype(jnp.bfloat16)                # halve inter-layer footprint
        o_ref[...] = h.astype(o_ref.dtype)

    return kernel


def init_params(key, layer_sizes):
    """PyTorch-style nn.Linear init; weights stored torch-style (out, in)."""
    params = []
    for n_in, n_out in zip(layer_sizes[:-1], layer_sizes[1:]):
        key, kw, kb = jax.random.split(key, 3)
        bound = 1.0 / float(n_in) ** 0.5
        w = jax.random.uniform(kw, (n_out, n_in), jnp.float32, -bound, bound)
        b = jax.random.uniform(kb, (n_out,), jnp.float32, -bound, bound)
        params.append((w, b))
    return params


def prepare_params(params):
    """One-time, OUTSIDE the jitted forward: transpose each weight to (in, out),
    zero-pad feature dims to the per-generation lane alignment, cast to bf16."""
    prepped = []
    for w, b in params:
        n_out, n_in = w.shape
        in_p, out_p = _feature_align(n_in), _feature_align(n_out)
        w_t = jnp.zeros((in_p, out_p), jnp.float32).at[:n_in, :n_out].set(w.T)
        b_p = jnp.zeros((1, out_p), jnp.float32).at[0, :n_out].set(b)
        prepped.append((w_t.astype(jnp.bfloat16), b_p))
    return prepped


def _chunk_layers(prepped, budget_bytes):
    """Group consecutive layers so each group's resident weight bytes fit the
    per-generation VMEM budget (gates the all-weights-resident fusion)."""
    chunks, cur, cur_bytes = [], [], 0
    for w, b in prepped:
        nb = w.size * w.dtype.itemsize + b.size * b.dtype.itemsize
        if cur and cur_bytes + nb > budget_bytes:
            chunks.append(cur)
            cur, cur_bytes = [], 0
        # TODO(synk): a single layer whose weight alone exceeds the budget
        # needs a K-tiled per-layer kernel (P3 accumulator); not implemented.
        cur.append((w, b))
        cur_bytes += nb
    if cur:
        chunks.append(cur)
    return chunks


def _fused_chunk_call(x_in, chunk, tile_b, grid_steps, out_dtype):
    """One pallas_call running a fused chain of Layer.forward for `chunk`."""
    batch, in_pad = x_in.shape
    out_pad = chunk[-1][0].shape[1]

    kernel_args = [x_in]
    in_specs = [pl.BlockSpec((tile_b, in_pad), lambda i: (i, 0))]
    for w_t, b_p in chunk:
        kernel_args += [w_t, b_p]
        # Whole array, constant block index -> VMEM-resident; single buffer
        # (no re-fetch ever happens, so the default double buffer wastes VMEM).
        in_specs += [_bspec(w_t.shape, lambda i: (0, 0), buffers=1),
                     _bspec(b_p.shape, lambda i: (0, 0), buffers=1)]

    flops = 2 * grid_steps * tile_b * sum(
        int(w.shape[0]) * int(w.shape[1]) for w, _ in chunk)
    bytes_accessed = (x_in.size * x_in.dtype.itemsize
                      + batch * out_pad * jnp.dtype(out_dtype).itemsize
                      + sum(w.size * 2 + b.size * 4 for w, b in chunk))

    return pl.pallas_call(
        _make_layer_stack_kernel(len(chunk)),
        out_shape=jax.ShapeDtypeStruct((batch, out_pad), out_dtype),
        grid=(grid_steps,),
        in_specs=in_specs,
        out_specs=pl.BlockSpec((tile_b, out_pad), lambda i: (i, 0)),
        compiler_params=pltpu.CompilerParams(
            dimension_semantics=("parallel",),       # shard batch over TCs (v7x)
            vmem_limit_bytes=_vmem_limit_bytes()),
        cost_estimate=pl.CostEstimate(flops=int(flops), transcendentals=0,
                                      bytes_accessed=int(bytes_accessed)),
    )(*kernel_args)


@functools.partial(jax.jit, static_argnames=("out_dim",))
def layer_stack_forward(X, prepped_params, out_dim):
    """Chained Layer.forward (Linear + ReLU per layer) fused in Pallas.

    X: (batch, ...) -- trailing dims are flattened (wrapper glue; Layer is 2-D).
    prepped_params: output of prepare_params (already (in,out), padded, bf16).
    out_dim: true (unpadded) output width of the last Layer.
    """
    batch = X.shape[0]
    x2d = X.reshape(batch, -1)
    in_dim = x2d.shape[1]
    in_pad = prepped_params[0][0].shape[0]
    assert in_pad == _feature_align(in_dim), "params/input width mismatch"

    # Batch tiling: bound pad waste to <8 rows per tile and, when batch allows,
    # guarantee >= 2 grid steps so both v7x TensorCores get work.
    batch8 = _round_up(batch, SUBLANE)
    steps = _cdiv(batch8, MAX_TILE_B)
    if batch8 >= 2 * SUBLANE:
        steps = max(steps, 2)
    tile_b = _round_up(_cdiv(batch8, steps), SUBLANE)
    grid_steps = _cdiv(batch, tile_b)

    # Input: no materialized padded HBM copy when the feature dim is already
    # aligned -- stream x2d (f32) directly; the kernel casts to bf16 on the fly.
    # Partial last batch block is safe (row-wise op, masked writes).
    if in_dim == in_pad:
        x_in = x2d
    else:
        # Feature padding must be zero so pad columns can't inject NaN/Inf.
        pad_dtype = jnp.bfloat16 if tile_b % 16 == 0 else jnp.float32
        x_in = jnp.zeros((batch, in_pad), pad_dtype).at[:, :in_dim].set(
            x2d.astype(pad_dtype))

    # Gate the all-weights-resident fusion on the per-generation VMEM budget.
    chunks = _chunk_layers(prepped_params, int(_vmem_limit_bytes() * 0.6))

    h = x_in
    for ci, chunk in enumerate(chunks):
        last = ci == len(chunks) - 1
        inter_dtype = jnp.bfloat16 if tile_b % 16 == 0 else jnp.float32
        h = _fused_chunk_call(h, chunk, tile_b, grid_steps,
                              jnp.float32 if last else inter_dtype)
    return h[:, :out_dim]


def layer_forward(X, w, b):
    """Exact Pallas equivalent of a single Layer.forward: ReLU(X @ w.T + b)."""
    prepped = prepare_params([(w, b)])
    return layer_stack_forward(X, prepped, w.shape[0])


if __name__ == "__main__":
    key = jax.random.PRNGKey(0)
    k_x, k_p = jax.random.split(key)

    # Deterministic small input: batch=2, channels=4, 16x16 spatial -> 1024 feats.
    X = jax.random.normal(k_x, (2, 4, 16, 16), jnp.float32)
    layer_sizes = [4 * 16 * 16, 32, 32, 10]

    params = init_params(k_p, layer_sizes)
    prepped = prepare_params(params)   # transpose / pad / bf16 once, outside jit

    out = layer_stack_forward(X, prepped, layer_sizes[-1])
    out = jax.block_until_ready(out)

    # Pure-JAX f32 reference: repeated Layer.forward = ReLU(x @ W.T + b).
    def reference(X, params):
        x = X.reshape(X.shape[0], -1)
        for w, b in params:
            x = jnp.maximum(x @ w.T + b, 0.0)
        return x

    ref = reference(X, params)
    assert out.shape == (2, layer_sizes[-1])
    assert jnp.allclose(out, ref, atol=5e-2, rtol=5e-2), (
        "max abs err = %f" % float(jnp.max(jnp.abs(out - ref))))

    # Single-Layer check (exactly one Layer.forward).
    w0, b0 = params[0]
    out1 = jax.block_until_ready(layer_forward(X.reshape(2, -1), w0, b0))
    ref1 = jnp.maximum(X.reshape(2, -1) @ w0.T + b0, 0.0)
    assert out1.shape == (2, layer_sizes[1])
    assert jnp.allclose(out1, ref1, atol=5e-2, rtol=5e-2)

    print("KERNEL_OK")
</pallas_src>

<mosaic_0001>
module attributes {stable_mosaic.version = 11 : i64} {
  func.func @kernel(%arg0: i32, %arg1: memref<8x1024xf32, #tpu.memory_space<vmem>>, %arg2: memref<1024x128xbf16, #tpu.memory_space<vmem>>, %arg3: memref<1x128xf32, #tpu.memory_space<vmem>>, %arg4: memref<128x128xbf16, #tpu.memory_space<vmem>>, %arg5: memref<1x128xf32, #tpu.memory_space<vmem>>, %arg6: memref<128x128xbf16, #tpu.memory_space<vmem>>, %arg7: memref<1x128xf32, #tpu.memory_space<vmem>>, %arg8: memref<8x128xf32, #tpu.memory_space<vmem>>) attributes {dimension_semantics = [#tpu.dimension_semantics<parallel>], iteration_bounds = array<i64: 1>, scalar_prefetch = 0 : i64, scratch_operands = 0 : i64, tpu.core_type = #tpu.core_type<tc>, window_params = [{transform_indices = @transform_0, window_bounds = array<i64: 8, 1024>}, {pipeline_mode = #tpu.pipeline_mode<synchronous>, transform_indices = @transform_1, window_bounds = array<i64: 1024, 128>}, {pipeline_mode = #tpu.pipeline_mode<synchronous>, transform_indices = @transform_2, window_bounds = array<i64: 1, 128>}, {pipeline_mode = #tpu.pipeline_mode<synchronous>, transform_indices = @transform_3, window_bounds = array<i64: 128, 128>}, {pipeline_mode = #tpu.pipeline_mode<synchronous>, transform_indices = @transform_4, window_bounds = array<i64: 1, 128>}, {pipeline_mode = #tpu.pipeline_mode<synchronous>, transform_indices = @transform_5, window_bounds = array<i64: 128, 128>}, {pipeline_mode = #tpu.pipeline_mode<synchronous>, transform_indices = @transform_6, window_bounds = array<i64: 1, 128>}, {transform_indices = @transform_7, window_bounds = array<i64: 8, 128>}]} {
    %c0 = arith.constant 0 : index
    %c0_0 = arith.constant 0 : index
    %0 = vector.load %arg1[%c0, %c0_0] : memref<8x1024xf32, #tpu.memory_space<vmem>>, vector<8x1024xf32>
    %1 = arith.truncf %0 : vector<8x1024xf32> to vector<8x1024xbf16>
    %c0_1 = arith.constant 0 : index
    %c0_2 = arith.constant 0 : index
    %2 = vector.load %arg2[%c0_1, %c0_2] : memref<1024x128xbf16, #tpu.memory_space<vmem>>, vector<1024x128xbf16>
    %cst = arith.constant dense<0.000000e+00> : vector<8x128xf32>
    %3 = tpu.matmul %1, %2, %cst {dimension_numbers = #tpu.dot_dimension_numbers<[1], [0], [0], [1], [0, 0, 1, 1], [], []>} : vector<8x1024xbf16>, vector<1024x128xbf16>, vector<8x128xf32> -> vector<8x128xf32>
    %c0_3 = arith.constant 0 : index
    %c0_4 = arith.constant 0 : index
    %4 = vector.load %arg3[%c0_3, %c0_4] : memref<1x128xf32, #tpu.memory_space<vmem>>, vector<1x128xf32>
    %5 = vector.broadcast %4 : vector<1x128xf32> to vector<8x128xf32>
    %6 = arith.addf %3, %5 : vector<8x128xf32>
    %cst_5 = arith.constant 0.000000e+00 : f32
    %7 = vector.broadcast %cst_5 : f32 to vector<8x128xf32>
    %8 = arith.maximumf %6, %7 : vector<8x128xf32>
    %9 = arith.truncf %8 : vector<8x128xf32> to vector<8x128xbf16>
    %c0_6 = arith.constant 0 : index
    %c0_7 = arith.constant 0 : index
    %10 = vector.load %arg4[%c0_6, %c0_7] : memref<128x128xbf16, #tpu.memory_space<vmem>>, vector<128x128xbf16>
    %cst_8 = arith.constant dense<0.000000e+00> : vector<8x128xf32>
    %11 = tpu.matmul %9, %10, %cst_8 {dimension_numbers = #tpu.dot_dimension_numbers<[1], [0], [0], [1], [0, 0, 1, 1], [], []>} : vector<8x128xbf16>, vector<128x128xbf16>, vector<8x128xf32> -> vector<8x128xf32>
    %c0_9 = arith.constant 0 : index
    %c0_10 = arith.constant 0 : index
    %12 = vector.load %arg5[%c0_9, %c0_10] : memref<1x128xf32, #tpu.memory_space<vmem>>, vector<1x128xf32>
    %13 = vector.broadcast %12 : vector<1x128xf32> to vector<8x128xf32>
    %14 = arith.addf %11, %13 : vector<8x128xf32>
    %cst_11 = arith.constant 0.000000e+00 : f32
    %15 = vector.broadcast %cst_11 : f32 to vector<8x128xf32>
    %16 = arith.maximumf %14, %15 : vector<8x128xf32>
    %17 = arith.truncf %16 : vector<8x128xf32> to vector<8x128xbf16>
    %c0_12 = arith.constant 0 : index
    %c0_13 = arith.constant 0 : index
    %18 = vector.load %arg6[%c0_12, %c0_13] : memref<128x128xbf16, #tpu.memory_space<vmem>>, vector<128x128xbf16>
    %cst_14 = arith.constant dense<0.000000e+00> : vector<8x128xf32>
    %19 = tpu.matmul %17, %18, %cst_14 {dimension_numbers = #tpu.dot_dimension_numbers<[1], [0], [0], [1], [0, 0, 1, 1], [], []>} : vector<8x128xbf16>, vector<128x128xbf16>, vector<8x128xf32> -> vector<8x128xf32>
    %c0_15 = arith.constant 0 : index
    %c0_16 = arith.constant 0 : index
    %20 = vector.load %arg7[%c0_15, %c0_16] : memref<1x128xf32, #tpu.memory_space<vmem>>, vector<1x128xf32>
    %21 = vector.broadcast %20 : vector<1x128xf32> to vector<8x128xf32>
    %22 = arith.addf %19, %21 : vector<8x128xf32>
    %cst_17 = arith.constant 0.000000e+00 : f32
    %23 = vector.broadcast %cst_17 : f32 to vector<8x128xf32>
    %24 = arith.maximumf %22, %23 : vector<8x128xf32>
    %c0_18 = arith.constant 0 : index
    %c0_19 = arith.constant 0 : index
    %25 = vector.load %arg8[%c0_18, %c0_19] : memref<8x128xf32, #tpu.memory_space<vmem>>, vector<8x128xf32>
    tpu.vector_store %arg8[%c0_18, %c0_19], %24 {strides = array<i32>} : memref<8x128xf32, #tpu.memory_space<vmem>>, vector<8x128xf32>,
    return
  }
  func.func @transform_0(%arg0: i32) -> (i32, i32) {
    %c0_i32 = arith.constant 0 : i32
    %c0_i32_0 = arith.constant 0 : i32
    return %arg0, %c0_i32 : i32, i32
  }
  func.func @transform_1(%arg0: i32) -> (i32, i32) {
    %c0_i32 = arith.constant 0 : i32
    %c0_i32_0 = arith.constant 0 : i32
    %c0_i32_1 = arith.constant 0 : i32
    return %c0_i32, %c0_i32_0 : i32, i32
  }
  func.func @transform_2(%arg0: i32) -> (i32, i32) {
    %c0_i32 = arith.constant 0 : i32
    %c0_i32_0 = arith.constant 0 : i32
    %c0_i32_1 = arith.constant 0 : i32
    return %c0_i32, %c0_i32_0 : i32, i32
  }
  func.func @transform_3(%arg0: i32) -> (i32, i32) {
    %c0_i32 = arith.constant 0 : i32
    %c0_i32_0 = arith.constant 0 : i32
    %c0_i32_1 = arith.constant 0 : i32
    return %c0_i32, %c0_i32_0 : i32, i32
  }
  func.func @transform_4(%arg0: i32) -> (i32, i32) {
    %c0_i32 = arith.constant 0 : i32
    %c0_i32_0 = arith.constant 0 : i32
    %c0_i32_1 = arith.constant 0 : i32
    return %c0_i32, %c0_i32_0 : i32, i32
  }
  func.func @transform_5(%arg0: i32) -> (i32, i32) {
    %c0_i32 = arith.constant 0 : i32
    %c0_i32_0 = arith.constant 0 : i32
    %c0_i32_1 = arith.constant 0 : i32
    return %c0_i32, %c0_i32_0 : i32, i32
  }
  func.func @transform_6(%arg0: i32) -> (i32, i32) {
    %c0_i32 = arith.constant 0 : i32
    %c0_i32_0 = arith.constant 0 : i32
    %c0_i32_1 = arith.constant 0 : i32
    return %c0_i32, %c0_i32_0 : i32, i32
  }
  func.func @transform_7(%arg0: i32) -> (i32, i32) {
    %c0_i32 = arith.constant 0 : i32
    %c0_i32_0 = arith.constant 0 : i32
    return %arg0, %c0_i32 : i32, i32
  }
}

</mosaic_0001>

<bundles_post_ra>
// kernel: layer_stack_forward.1
= control target key start
LH: loop header
LB: loop body
LE: loop exit
PB: predicated region body
PF: predicated region fallthrough
CT: control target
= control target key end

     0   :  { %12 = vsyncpa [#allocation3], 0  ;;  %s1862_s0 = inlined_call_operand.hbm [shape: f32[2,1024], index: 0, kind: input, shape index: {}]   ;;  %s1863_s1 = inlined_call_operand.hbm [shape: bf16[1024,128], index: 1, kind: input, shape index: {}]   ;;  %s1864_s2 = inlined_call_operand.hbm [shape: f32[1,128], index: 2, kind: input, shape index: {}]   ;;  %s1865_s3 = inlined_call_operand.hbm [shape: bf16[128,128], index: 3, kind: input, shape index: {}]   ;;  %s1866_s4 = inlined_call_operand.hbm [shape: f32[1,128], index: 4, kind: input, shape index: {}]   ;;  %s1867_s5 = inlined_call_operand.hbm [shape: bf16[128,128], index: 5, kind: input, shape index: {}]   ;;  %s1868_s6 = inlined_call_operand.hbm [shape: f32[1,128], index: 6, kind: input, shape index: {}]   ;;  %s1869_s7 = inlined_call_operand.hbm [shape: f32[2,128], index: 7, kind: output, shape index: {}]  }
   0x1   :  { %13 = vsyncpa [#allocation6], 0 }
   0x2   :  { %14 = vsyncpa [#allocation9], 0 }
   0x3   :  { %15 = vsyncpa [#allocation12], 0 }
   0x4   :  { %16 = vsyncpa [#allocation4], 0 }
   0x5   :  { %21 = vsyncadd [#allocation3], 768  ;;  %s1672_s24 = smov [#allocation5]   ;;  %s1486_s28 = scalar_lea.hbm %s1863_s1, 8192 }
   0x6   :  { %s34_s25 = sshll.u32 %s1672_s24, 4  ;;  %p1487_p0 = scmp.ne.s32.totalorder %s1863_s1, %s1486_s28  ;;  %s35_s25 = int_to_ptr.vmem [resolvable:$true] %s34_s25 }
   0x7   :  { %p1490_p1 = scmp.lt.u32.totalorder %s1486_s28, %s1863_s1 }
   0x9   :  { %p1492_p2 = pnand %p1490_p1, %p1487_p0 }
   0xb   :  { %1495 = shalt.err (!%p1492_p2)
}
   0xc   :  { %s1496_s10 = scalar_lea.vmem %s35_s25, 8192  ;;  %p1501_p4 = scmp.lt.s32.totalorder %s35_s25, %s35_s25 }
   0xd   :  { %p1497_p3 = scmp.ne.s32.totalorder %s35_s25, %s1496_s10  ;;  %p1502_p5 = scmp.lt.s32.totalorder %s1496_s10, %s1496_s10 }
   0xf   :  { %p1503_p6 = por %p1502_p5, %p1501_p4 }
  0x11   :  { %p1504_p7 = pnand %p1503_p6, %p1497_p3 }
  0x13   :  { %1507 = shalt.err (!%p1504_p7)
}
  0x14   :  { %s1673_s11 = smov 64   ;;  %s1674_s12 = smov 4  }
  0x15   :  { %40 = dma.hbm_to_vmem [thread:$0]  %s1863_s1, 8192, %s35_s25, [#allocation6], %s1673_s11, %s1673_s11, %s1674_s12  }
  0x16   :  { %s1675_s15 = smov [#allocation8]   ;;  %s1676_s17 = smov [#allocation11]  }
  0x17   :  { %s56_s16 = sshll.u32 %s1675_s15, 4  ;;  %s78_s18 = sshll.u32 %s1676_s17, 4  ;;  %s57_s16 = int_to_ptr.vmem [resolvable:$true] %s56_s16  ;;  %s79_s18 = int_to_ptr.vmem [resolvable:$true] %s78_s18 }
  0x18   :  { %s1508_s21 = scalar_lea.hbm %s1865_s3, 1024 }
  0x19   :  { %p1509_p8 = scmp.ne.s32.totalorder %s1865_s3, %s1508_s21  ;;  %p1512_p9 = scmp.lt.u32.totalorder %s1508_s21, %s1865_s3 }
  0x1b   :  { %p1514_p10 = pnand %p1512_p9, %p1509_p8 }
  0x1d   :  { %1517 = shalt.err (!%p1514_p10)
}
  0x1e   :  { %s1518_s1 = scalar_lea.vmem %s57_s16, 1024  ;;  %p1523_p12 = scmp.lt.s32.totalorder %s57_s16, %s57_s16 }
  0x1f   :  { %p1519_p11 = scmp.ne.s32.totalorder %s57_s16, %s1518_s1  ;;  %p1524_p13 = scmp.lt.s32.totalorder %s1518_s1, %s1518_s1 }
  0x21   :  { %p1525_p0 = por %p1524_p13, %p1523_p12 }
  0x23   :  { %p1526_p1 = pnand %p1525_p0, %p1519_p11 }
  0x25   :  { %1529 = shalt.err (!%p1526_p1)
}
  0x26   :  { %62 = dma.hbm_to_vmem [thread:$0]  %s1865_s3, 1024, %s57_s16, [#allocation9], %s1673_s11, %s1673_s11, %s1674_s12  }
  0x27   :  { %s1530_s30 = scalar_lea.hbm %s1867_s5, 1024 }
  0x28   :  { %p1531_p2 = scmp.ne.s32.totalorder %s1867_s5, %s1530_s30  ;;  %p1534_p3 = scmp.lt.u32.totalorder %s1530_s30, %s1867_s5 }
  0x2a   :  { %p1536_p4 = pnand %p1534_p3, %p1531_p2 }
  0x2c   :  { %1539 = shalt.err (!%p1536_p4)
}
  0x2d   :  { %s1540_s14 = scalar_lea.vmem %s79_s18, 1024  ;;  %p1545_p6 = scmp.lt.s32.totalorder %s79_s18, %s79_s18 }
  0x2e   :  { %p1541_p5 = scmp.ne.s32.totalorder %s79_s18, %s1540_s14  ;;  %p1546_p7 = scmp.lt.s32.totalorder %s1540_s14, %s1540_s14 }
  0x30   :  { %p1547_p8 = por %p1546_p7, %p1545_p6 }
  0x32   :  { %p1548_p9 = pnand %p1547_p8, %p1541_p5 }
  0x34   :  { %1551 = shalt.err (!%p1548_p9)
}
  0x35   :  { %84 = dma.hbm_to_vmem [thread:$0]  %s1867_s5, 1024, %s79_s18, [#allocation12], %s1673_s11, %s1673_s11, %s1674_s12  }
  0x36   :  { %s1677_s16 = smov [#allocation2]   ;;  %s1552_s21 = scalar_lea.hbm %s1862_s0, 256 }
  0x37   :  { %s22_s17 = sshll.u32 %s1677_s16, 4  ;;  %p1553_p10 = scmp.ne.s32.totalorder %s1862_s0, %s1552_s21  ;;  %s23_s17 = int_to_ptr.vmem [resolvable:$true] %s22_s17 }
  0x38   :  { %p1556_p11 = scmp.lt.u32.totalorder %s1552_s21, %s1862_s0 }
  0x3a   :  { %p1558_p12 = pnand %p1556_p11, %p1553_p10 }
  0x3c   :  { %1561 = shalt.err (!%p1558_p12)
}
  0x3d   :  { %s1562_s1 = scalar_lea.vmem %s23_s17, 256  ;;  %s1566_s5 = scalar_lea.vmem %s23_s17, 1024 }
  0x3e   :  { %p1563_p13 = scmp.ne.s32.totalorder %s23_s17, %s1562_s1  ;;  %p1567_p0 = scmp.lt.s32.totalorder %s23_s17, %s23_s17 }
  0x3f   :  { %p1568_p1 = scmp.lt.s32.totalorder %s1566_s5, %s1562_s1 }
  0x41   :  { %p1569_p2 = por %p1568_p1, %p1567_p0 }
  0x43   :  { %p1570_p3 = pnand %p1569_p2, %p1563_p13 }
  0x45   :  { %1573 = shalt.err (!%p1570_p3)
}
  0x46   :  { %s1678_s11 = smov 256   ;;  %s1679_s12 = smov 16  }
  0x47   :  { %28 = dma.hbm_to_vmem [thread:$0]  %s1862_s0, 256, %s23_s17, [#allocation3], %s1678_s11, %s1678_s11, %s1679_s12  }
  0x48   :  { %s1680_s27 = smov [#allocation7]   ;;  %s1681_s29 = smov [#allocation10]  }
  0x49   :  { %s47_s28 = sshll.u32 %s1680_s27, 4  ;;  %s69_s30 = sshll.u32 %s1681_s29, 4  ;;  %s48_s28 = int_to_ptr.vmem [resolvable:$true] %s47_s28  ;;  %s70_s30 = int_to_ptr.vmem [resolvable:$true] %s69_s30 }
  0x4a   :  { %s1574_s10 = scalar_lea.hbm %s1864_s2, 16 }
  0x4b   :  { %p1575_p4 = scmp.ne.s32.totalorder %s1864_s2, %s1574_s10  ;;  %p1578_p5 = scmp.lt.u32.totalorder %s1574_s10, %s1864_s2 }
  0x4d   :  { %p1580_p6 = pnand %p1578_p5, %p1575_p4 }
  0x4f   :  { %1583 = shalt.err (!%p1580_p6)
}
  0x50   :  { %s1584_s0 = scalar_lea.vmem %s48_s28, 16  ;;  %s1588_s16 = scalar_lea.vmem %s48_s28, 32 }
  0x51   :  { %p1585_p7 = scmp.ne.s32.totalorder %s48_s28, %s1584_s0  ;;  %p1589_p8 = scmp.lt.s32.totalorder %s48_s28, %s48_s28 }
  0x52   :  { %p1590_p9 = scmp.lt.s32.totalorder %s1588_s16, %s1584_s0 }
  0x54   :  { %p1591_p10 = por %p1590_p9, %p1589_p8 }
  0x56   :  { %p1592_p11 = pnand %p1591_p10, %p1585_p7 }
  0x58   :  { %1595 = shalt.err (!%p1592_p11)
}
  0x59   :  { %50 = dma.hbm_to_vmem [thread:$0]  %s1864_s2, 16, %s48_s28, [#allocation6]  }
  0x5a   :  { %s1596_s22 = scalar_lea.hbm %s1866_s4, 16 }
  0x5b   :  { %p1597_p12 = scmp.ne.s32.totalorder %s1866_s4, %s1596_s22  ;;  %p1600_p13 = scmp.lt.u32.totalorder %s1596_s22, %s1866_s4 }
  0x5d   :  { %p1602_p0 = pnand %p1600_p13, %p1597_p12 }
  0x5f   :  { %1605 = shalt.err (!%p1602_p0)
}
  0x60   :  { %s1606_s5 = scalar_lea.vmem %s70_s30, 16  ;;  %s1610_s11 = scalar_lea.vmem %s70_s30, 32 }
  0x61   :  { %p1607_p1 = scmp.ne.s32.totalorder %s70_s30, %s1606_s5  ;;  %p1611_p2 = scmp.lt.s32.totalorder %s70_s30, %s70_s30 }
  0x62   :  { %p1612_p3 = scmp.lt.s32.totalorder %s1610_s11, %s1606_s5 }
  0x64   :  { %p1613_p4 = por %p1612_p3, %p1611_p2 }
  0x66   :  { %p1614_p5 = pnand %p1613_p4, %p1607_p1 }
  0x68   :  { %1617 = shalt.err (!%p1614_p5)
}
  0x69   :  { %72 = dma.hbm_to_vmem [thread:$0]  %s1866_s4, 16, %s70_s30, [#allocation9]  }
  0x6a   :  { %s1682_s18 = smov [#allocation13]   ;;  %s1618_s29 = scalar_lea.hbm %s1868_s6, 16 }
  0x6b   :  { %s91_s25 = sshll.u32 %s1682_s18, 4  ;;  %p1619_p6 = scmp.ne.s32.totalorder %s1868_s6, %s1618_s29  ;;  %s92_s25 = int_to_ptr.vmem [resolvable:$true] %s91_s25 }
  0x6c   :  { %p1622_p7 = scmp.lt.u32.totalorder %s1618_s29, %s1868_s6 }
  0x6e   :  { %p1624_p8 = pnand %p1622_p7, %p1619_p6 }
  0x70   :  { %1627 = shalt.err (!%p1624_p8)
}
  0x71   :  { %s1628_s14 = scalar_lea.vmem %s92_s25, 16  ;;  %s1632_s4 = scalar_lea.vmem %s92_s25, 32 }
  0x72   :  { %p1629_p9 = scmp.ne.s32.totalorder %s92_s25, %s1628_s14  ;;  %p1633_p10 = scmp.lt.s32.totalorder %s92_s25, %s92_s25 }
  0x73   :  { %p1634_p11 = scmp.lt.s32.totalorder %s1632_s4, %s1628_s14 }
  0x75   :  { %p1635_p12 = por %p1634_p11, %p1633_p10 }
  0x77   :  { %p1636_p13 = pnand %p1635_p12, %p1629_p9 }
  0x79   :  { %1639 = shalt.err (!%p1636_p13)
}
  0x7a   :  { %94 = dma.hbm_to_vmem [thread:$0]  %s1868_s6, 16, %s92_s25, [#allocation12]  }
  0x7b   :  { %1662 = dma.done.wait [#allocation3], 1024  }
  0x7c   :  { %1663 = vsyncadd [#allocation3], 4294966272 }
  0x7d   :  { %1664 = dma.done.wait [#allocation6], 8208  }
  0x7e   :  { %1665 = vsyncadd [#allocation6], 4294959088 }
  0x7f   :  { %1666 = dma.done.wait [#allocation9], 1040  }
  0x80   :  { %1667 = vsyncadd [#allocation9], 4294966256 }
  0x81   :  { %1668 = dma.done.wait [#allocation12], 1040  }
  0x82   :  { %1669 = vsyncadd [#allocation12], 4294966256  ;;  %v1394_v0 = vld [vmem:[#allocation5 + $0x40] sm:$0xff]   ;;  %v1398_v4 = vld [vmem:[#allocation5 + $0x48] sm:$0xff]   ;;  %v1683_v24 = vmov 1983009808   ;;  %v140_v26 = vlaneseq }
  0x83   :  { %v1395_v1 = vld [vmem:[#allocation5 + $0xc0] sm:$0xff]   ;;  %1231 = vmatprep.subr.bf16.mxu0 %v1394_v0  ;;  %v1399_v5 = vld [vmem:[#allocation5 + $0xc8] sm:$0xff]   ;;  %v1402_v8 = vld [vmem:[#allocation5 + $0x50] sm:$0xff]   ;;  %v138_v25 = vunpack.c.l.s4 %v1683_v24  ;;  %vm1685_vm0 = vmmov 0  }
  0x84   :  { %v1396_v2 = vld [vmem:[#allocation5] sm:$0xff]   ;;  %1253 = vmatprep.subr.bf16.mxu1 %v1395_v1  ;;  %v1400_v6 = vld [vmem:[#allocation5 + $0x8] sm:$0xff]   ;;  %v1403_v9 = vld [vmem:[#allocation5 + $0xd0] sm:$0xff]   ;;  %v141_v32 = vshrl.u32 %v140_v26, 7 }
  0x85   :  { %v1397_v3 = vld [vmem:[#allocation5 + $0x80] sm:$0xff]   ;;  %1232 = vmatpush3.bf16.msra.mxu0 %v1396_v2  ;;  %v1401_v7 = vld [vmem:[#allocation5 + $0x88] sm:$0xff]   ;;  %v1404_v10 = vld [vmem:[#allocation5 + $0x10] sm:$0xff]   ;;  %v139_v31 = vunpack.c.0.s8 %v138_v25 }
  0x86   :  { %1254 = vmatpush3.bf16.msra.mxu1 %v1397_v3  ;;  %1233 = vmatprep.subr.bf16.mxu0 %v1398_v4  ;;  %v1405_v11 = vld [vmem:[#allocation5 + $0x90] sm:$0xff]   ;;  %v1406_v12 = vld [vmem:[#allocation5 + $0x58] sm:$0xff]   ;;  %v1410_v16 = vld [vmem:[#allocation5 + $0x60] sm:$0xff]  }
  0x87   :  { %1255 = vmatprep.subr.bf16.mxu1 %v1399_v5  ;;  %v1407_v13 = vld [vmem:[#allocation5 + $0xd8] sm:$0xff]   ;;  %v1411_v17 = vld [vmem:[#allocation5 + $0xe0] sm:$0xff]   ;;  %v1414_v20 = vld [vmem:[#allocation5 + $0x68] sm:$0xff]   ;;  %v1822_v37 = vsub.s32 %v139_v31, %v141_v32 }
  0x88   :  { %v1408_v14 = vld [vmem:[#allocation5 + $0x18] sm:$0xff]   ;;  %v1412_v18 = vld [vmem:[#allocation5 + $0x20] sm:$0xff]   ;;  %v1415_v21 = vld [vmem:[#allocation5 + $0xe8] sm:$0xff]  }
  0x89   :  { %1234 = vmatpush3.bf16.msra.mxu0 %v1400_v6  ;;  %v1409_v15 = vld [vmem:[#allocation5 + $0x98] sm:$0xff]   ;;  %v1413_v19 = vld [vmem:[#allocation5 + $0xa0] sm:$0xff]   ;;  %v1416_v22 = vld [vmem:[#allocation5 + $0x28] sm:$0xff]  }
  0x8a   :  { %1256 = vmatpush3.bf16.msra.mxu1 %v1401_v7  ;;  %1235 = vmatprep.subr.bf16.mxu0 %v1402_v8  ;;  %v1417_v23 = vld [vmem:[#allocation5 + $0xa8] sm:$0xff]   ;;  %v1418_v27 = vld [vmem:[#allocation5 + $0x70] sm:$0xff]   ;;  %v1422_v33 = vld [vmem:[#allocation5 + $0x78] sm:$0xff]  }
  0x8b   :  { %1257 = vmatprep.subr.bf16.mxu1 %v1403_v9  ;;  %v1419_v28 = vld [vmem:[#allocation5 + $0xf0] sm:$0xff]   ;;  %v1423_v34 = vld [vmem:[#allocation5 + $0xf8] sm:$0xff]   ;;  %v1432_v44 = vld [vmem:[#allocation5 + $0x140] sm:$0xff]  }
  0x8c   :  { %v1420_v29 = vld [vmem:[#allocation5 + $0x30] sm:$0xff]   ;;  %v1424_v35 = vld [vmem:[#allocation5 + $0x38] sm:$0xff]   ;;  %v1433_v47 = vld [vmem:[#allocation5 + $0x1c0] sm:$0xff]  }
  0x8d   :  { %1236 = vmatpush3.bf16.msra.mxu0 %v1404_v10  ;;  %v1421_v30 = vld [vmem:[#allocation5 + $0xb0] sm:$0xff]   ;;  %v1425_v36 = vld [vmem:[#allocation5 + $0xb8] sm:$0xff]   ;;  %v1434_v50 = vld [vmem:[#allocation5 + $0x100] sm:$0xff]  }
  0x8e   :  { %1258 = vmatpush3.bf16.msra.mxu1 %v1405_v11  ;;  %1237 = vmatprep.subr.bf16.mxu0 %v1406_v12  ;;  %v1426_v38 = vld [vmem:[#allocation2] ss:$16 sps:$4 sm:$0xff]   ;;  %v1430_v40 = vld [vmem:[#allocation2 + $0x4] ss:$16 sps:$4 sm:$0xff]   ;;  %v1436_v56 = vld [vmem:[#allocation5 + $0x148] sm:$0xff]  }
  0x8f   :  { %1259 = vmatprep.subr.bf16.mxu1 %v1407_v13  ;;  %v1428_v39 = vld [vmem:[#allocation2 + $0x20] ss:$16 sps:$4 sm:$0xff]   ;;  %v1431_v41 = vld [vmem:[#allocation2 + $0x24] ss:$16 sps:$4 sm:$0xff]   ;;  %v143_v42 = vrot.slane %v1426_v38, %v1822_v37  ;;  %v150_v45 = vrot.slane %v1430_v40, %v1822_v37  ;;  %v1437_v59 = vld [vmem:[#allocation5 + $0x1c8] sm:$0xff]   ;;  %v1684_v40 = vmov 0.0  }
  0x90   :  { %v157_v43 = vrot.slane %v1428_v39, %v1822_v37  ;;  %v164_v46 = vrot.slane %v1431_v41, %v1822_v37  ;;  %v1435_v53 = vld [vmem:[#allocation5 + $0x180] sm:$0xff]   ;;  %v1438_v60 = vld [vmem:[#allocation5 + $0x108] sm:$0xff]   ;;  %v1440_v62 = vld [vmem:[#allocation5 + $0x150] sm:$0xff]  }
  0x91   :  { %1238 = vmatpush3.bf16.msra.mxu0 %v1408_v14  ;;  %v1439_v61 = vld [vmem:[#allocation5 + $0x188] sm:$0xff]   ;;  %v1441_v63 = vld [vmem:[#allocation5 + $0x1d0] sm:$0xff]   ;;  %v1444_v2 = vld [vmem:[#allocation5 + $0x158] sm:$0xff]  }
  0x92   :  { %1260 = vmatpush3.bf16.msra.mxu1 %v1409_v15  ;;  %1239 = vmatprep.subr.bf16.mxu0 %v1410_v16  ;;  %v166_v48 = vcombine.high %v143_v42, %v157_v43  ;;  %v165_v49 = vcombine.low %v143_v42, %v157_v43  ;;  %v168_v51 = vcombine.high %v150_v45, %v164_v46  ;;  %v1442_v0 = vld [vmem:[#allocation5 + $0x110] sm:$0xff]   ;;  %v1445_v3 = vld [vmem:[#allocation5 + $0x1d8] sm:$0xff]   ;;  %v1448_v6 = vld [vmem:[#allocation5 + $0x160] sm:$0xff]  }
  0x93   :  { %1261 = vmatprep.subr.bf16.mxu1 %v1411_v17  ;;  %v167_v52 = vcombine.low %v150_v45, %v164_v46  ;;  %v1443_v1 = vld [vmem:[#allocation5 + $0x190] sm:$0xff]   ;;  %v1446_v4 = vld [vmem:[#allocation5 + $0x118] sm:$0xff]   ;;  %v1449_v7 = vld [vmem:[#allocation5 + $0x1e0] sm:$0xff]  }
  0x94   :  { %v214_v54 = vpack.c.bf16 %v166_v48, %v166_v48  ;;  %v213_v55 = vpack.c.bf16 %v165_v49, %v165_v49  ;;  %v216_v57 = vpack.c.bf16 %v168_v51, %v168_v51  ;;  %v1447_v5 = vld [vmem:[#allocation5 + $0x198] sm:$0xff]   ;;  %v1450_v8 = vld [vmem:[#allocation5 + $0x120] sm:$0xff]   ;;  %v1452_v10 = vld [vmem:[#allocation5 + $0x168] sm:$0xff]  }
  0x95   :  { %1240 = vmatpush3.bf16.msra.mxu0 %v1412_v18  ;;  %v215_v58 = vpack.c.bf16 %v167_v52, %v167_v52  ;;  %v1451_v9 = vld [vmem:[#allocation5 + $0x1a0] sm:$0xff]   ;;  %v1453_v11 = vld [vmem:[#allocation5 + $0x1e8] sm:$0xff]   ;;  %v1456_v14 = vld [vmem:[#allocation5 + $0x170] sm:$0xff]  }
  0x96   :  { %1262 = vmatpush3.bf16.msra.mxu1 %v1413_v19  ;;  %1241 = vmatprep.subr.bf16.mxu0 %v1414_v20  ;;  %v1454_v12 = vld [vmem:[#allocation5 + $0x128] sm:$0xff]   ;;  %v1457_v15 = vld [vmem:[#allocation5 + $0x1f0] sm:$0xff]   ;;  %v1460_v18 = vld [vmem:[#allocation5 + $0x178] sm:$0xff]  }
  0x97   :  { %1263 = vmatprep.subr.bf16.mxu1 %v1415_v21  ;;  %772 = vmatprep.mubr.bf16.mxu0 %v214_v54  ;;  %v1455_v13 = vld [vmem:[#allocation5 + $0x1a8] sm:$0xff]   ;;  %v1458_v16 = vld [vmem:[#allocation5 + $0x130] sm:$0xff]   ;;  %v1461_v19 = vld [vmem:[#allocation5 + $0x1f8] sm:$0xff]  }
  0x98   :  { %812 = vmatprep.mubr.bf16.mxu1 %v216_v57  ;;  %v1459_v17 = vld [vmem:[#allocation5 + $0x1b0] sm:$0xff]   ;;  %v1462_v20 = vld [vmem:[#allocation5 + $0x138] sm:$0xff]   ;;  %v1470_v39 = vld [vmem:[#allocation8] sm:$0xff]  }
  0x99   :  { %1242 = vmatpush3.bf16.msra.mxu0 %v1416_v22  ;;  %v1463_v21 = vld [vmem:[#allocation5 + $0x1b8] sm:$0xff]   ;;  %v1474_v43 = vld [vmem:[#allocation8 + $0x20] sm:$0xff]   ;;  %v1479_v48 = vld [vmem:[#allocation11 + $0x8] sm:$0xff]  }
  0x9a   :  { %1264 = vmatpush3.bf16.msra.mxu1 %v1417_v23  ;;  %1243 = vmatprep.subr.bf16.mxu0 %v1418_v27  ;;  %v1464_v22 = vld [vmem:[#allocation2 + $0x8] ss:$16 sps:$4 sm:$0xff]   ;;  %v1468_v24 = vld [vmem:[#allocation2 + $0xc] ss:$16 sps:$4 sm:$0xff]  }
  0x9b   :  { %1265 = vmatprep.subr.bf16.mxu1 %v1419_v28  ;;  %v1466_v23 = vld [vmem:[#allocation2 + $0x28] ss:$16 sps:$4 sm:$0xff]   ;;  %v1469_v25 = vld [vmem:[#allocation2 + $0x2c] ss:$16 sps:$4 sm:$0xff]   ;;  %v179_v26 = vrot.slane %v1464_v22, %v1822_v37  ;;  %v186_v28 = vrot.slane %v1468_v24, %v1822_v37 }
  0x9c   :  { %v193_v27 = vrot.slane %v1466_v23, %v1822_v37  ;;  %v1472_v41 = vld [vmem:[#allocation8 + $0x10] sm:$0xff]   ;;  %v1473_v42 = vld [vmem:[#allocation8 + $0x18] sm:$0xff]   ;;  %v1482_v51 = vld [vmem:[#allocation11 + $0x20] sm:$0xff]  }
  0x9d   :  { %1244 = vmatpush3.bf16.msra.mxu0 %v1420_v29  ;;  %v200_v29 = vrot.slane %v1469_v25, %v1822_v37  ;;  %v1471_v37 = vld [vmem:[#allocation8 + $0x8] sm:$0xff]   ;;  %v1476_v45 = vld [vmem:[#allocation8 + $0x30] sm:$0xff]   ;;  %v1477_v46 = vld [vmem:[#allocation8 + $0x38] sm:$0xff]  }
  0x9e   :  { %1266 = vmatpush3.bf16.msra.mxu1 %v1421_v30  ;;  %1245 = vmatprep.subr.bf16.mxu0 %v1422_v33  ;;  %v202_v30 = vcombine.high %v179_v26, %v193_v27  ;;  %v201_v31 = vcombine.low %v179_v26, %v193_v27  ;;  %v1480_v49 = vld [vmem:[#allocation11 + $0x10] sm:$0xff]   ;;  %v1483_v52 = vld [vmem:[#allocation11 + $0x28] sm:$0xff]   ;;  %v1222_v26 = vld [vmem:[#allocation13] ss:$0 sm:$0xff] }
  0x9f   :  { %1267 = vmatprep.subr.bf16.mxu1 %v1423_v34  ;;  %v204_v32 = vcombine.high %v186_v28, %v200_v29  ;;  %v203_v33 = vcombine.low %v186_v28, %v200_v29 }
  0xa0   :  { %v218_v34 = vpack.c.bf16 %v202_v30, %v202_v30 }
  0xa1   :  { %1246 = vmatpush3.bf16.msra.mxu0 %v1424_v35  ;;  %v217_v35 = vpack.c.bf16 %v201_v31, %v201_v31  ;;  %v219_v38 = vpack.c.bf16 %v203_v33, %v203_v33 }
  0xa2   :  { %1268 = vmatpush3.bf16.msra.mxu1 %v1425_v36  ;;  %1275 = vmatprep.subr.bf16.mxu0 %v1432_v44  ;;  %v220_v36 = vpack.c.bf16 %v204_v32, %v204_v32  ;;  %v1475_v44 = vld [vmem:[#allocation8 + $0x28] sm:$0xff]  }
  0xa3   :  { %1297 = vmatprep.subr.bf16.mxu1 %v1433_v47  ;;  %v1478_v47 = vld [vmem:[#allocation11] sm:$0xff]  }
  0xa4   :  { %773 = vmatmul.mubr.bf16.vlgmr.msra.gmra.mrb[0].mxu0 %v213_v55  ;;  %v1148_v55 = vld [vmem:[#allocation7] ss:$0 sm:$0xff] }
  0xa5   :  { %813 = vmatmul.mubr.bf16.vlgmr.msra.gmra.mrb[0].mxu1 %v215_v58  ;;  %1276 = vmatpush3.bf16.msra.mxu0 %v1434_v50  ;;  %v1481_v50 = vld [vmem:[#allocation11 + $0x18] sm:$0xff]  }
  0xa6   :  { %1298 = vmatpush3.bf16.msra.mxu1 %v1435_v53  ;;  %1277 = vmatprep.subr.bf16.mxu0 %v1436_v56 }
  0xa7   :  { %1299 = vmatprep.subr.bf16.mxu1 %v1437_v59  ;;  %852 = vmatprep.mubr.bf16.mxu0 %v218_v34 }
  0xa8   :  { %892 = vmatprep.mubr.bf16.mxu1 %v220_v36 }
  0xa9   :  { %1278 = vmatpush3.bf16.msra.mxu0 %v1438_v60 }
  0xaa   :  { %1300 = vmatpush3.bf16.msra.mxu1 %v1439_v61  ;;  %1279 = vmatprep.subr.bf16.mxu0 %v1440_v62 }
  0xab   :  { %1301 = vmatprep.subr.bf16.mxu1 %v1441_v63 }
  0xad   :  { %1280 = vmatpush3.bf16.msra.mxu0 %v1442_v0 }
  0xae   :  { %1302 = vmatpush3.bf16.msra.mxu1 %v1443_v1  ;;  %1281 = vmatprep.subr.bf16.mxu0 %v1444_v2 }
  0xaf   :  { %1303 = vmatprep.subr.bf16.mxu1 %v1445_v3 }
  0xb1   :  { %1282 = vmatpush3.bf16.msra.mxu0 %v1446_v4 }
  0xb2   :  { %1304 = vmatpush3.bf16.msra.mxu1 %v1447_v5  ;;  %1283 = vmatprep.subr.bf16.mxu0 %v1448_v6 }
  0xb3   :  { %1305 = vmatprep.subr.bf16.mxu1 %v1449_v7 }
  0xb5   :  { %1284 = vmatpush3.bf16.msra.mxu0 %v1450_v8 }
  0xb6   :  { %1306 = vmatpush3.bf16.msra.mxu1 %v1451_v9  ;;  %1285 = vmatprep.subr.bf16.mxu0 %v1452_v10 }
  0xb7   :  { %1307 = vmatprep.subr.bf16.mxu1 %v1453_v11 }
  0xb9   :  { %1286 = vmatpush3.bf16.msra.mxu0 %v1454_v12 }
  0xba   :  { %1308 = vmatpush3.bf16.msra.mxu1 %v1455_v13  ;;  %1287 = vmatprep.subr.bf16.mxu0 %v1456_v14 }
  0xbb   :  { %1309 = vmatprep.subr.bf16.mxu1 %v1457_v15 }
  0xbd   :  { %1288 = vmatpush3.bf16.msra.mxu0 %v1458_v16  ;;  %v1484_v16 = vld [vmem:[#allocation11 + $0x30] sm:$0xff]  }
  0xbe   :  { %1310 = vmatpush3.bf16.msra.mxu1 %v1459_v17  ;;  %1289 = vmatprep.subr.bf16.mxu0 %v1460_v18  ;;  %v1485_v17 = vld [vmem:[#allocation11 + $0x38] sm:$0xff]  }
  0xbf   :  { %1311 = vmatprep.subr.bf16.mxu1 %v1461_v19  ;;  %v1213_v18 = vld [vmem:[#allocation10] ss:$0 sm:$0xff] }
  0xc1   :  { %1290 = vmatpush3.bf16.msra.mxu0 %v1462_v20 }
  0xc2   :  { %1312 = vmatpush3.bf16.msra.mxu1 %v1463_v21  ;;  %1337 = vmatprep.subr.bf16.mxu0 %v1684_v40 }
  0xc3   :  { %1357 = vmatprep.subr.bf16.mxu1 %v1684_v40 }
  0xc4   :  { %853 = vmatmul.mubr.bf16.vlgmr.msra.gmra.mrb[4].mxu0 %v217_v35 }
  0xc5   :  { %893 = vmatmul.mubr.bf16.vlgmr.msra.gmra.mrb[4].mxu1 %v219_v38  ;;  %1338 = vmatpush3.bf16.msra.mxu0 %v1470_v39 }
  0xc6   :  { %1339 = vmatprep.subr.bf16.mxu0 %v1684_v40  ;;  %1353 = vmatprep.mubr.msk.bf16.mxu0 %vm1685_vm0, %v1684_v40 }
  0xc7   :  { %1373 = vmatprep.mubr.msk.bf16.mxu1 %vm1685_vm0, %v1684_v40  ;;  %1358 = vmatpush3.bf16.msra.mxu1 %v1478_v47 }
  0xc8   :  { %1359 = vmatprep.subr.bf16.mxu1 %v1684_v40 }
  0xc9   :  { %1340 = vmatpush3.bf16.msra.mxu0 %v1471_v37 }
  0xca   :  { %1341 = vmatprep.subr.bf16.mxu0 %v1684_v40 }
  0xcb   :  { %1360 = vmatpush3.bf16.msra.mxu1 %v1479_v48 }
  0xcc   :  { %1361 = vmatprep.subr.bf16.mxu1 %v1684_v40 }
  0xcd   :  { %1342 = vmatpush3.bf16.msra.mxu0 %v1472_v41 }
  0xce   :  { %1343 = vmatprep.subr.bf16.mxu0 %v1684_v40 }
  0xcf   :  { %1362 = vmatpush3.bf16.msra.mxu1 %v1480_v49 }
  0xd0   :  { %1363 = vmatprep.subr.bf16.mxu1 %v1684_v40 }
  0xd1   :  { %1344 = vmatpush3.bf16.msra.mxu0 %v1473_v42 }
  0xd2   :  { %1345 = vmatprep.subr.bf16.mxu0 %v1684_v40 }
  0xd3   :  { %1364 = vmatpush3.bf16.msra.mxu1 %v1481_v50 }
  0xd4   :  { %1365 = vmatprep.subr.bf16.mxu1 %v1684_v40 }
  0xd5   :  { %1346 = vmatpush3.bf16.msra.mxu0 %v1474_v43 }
  0xd6   :  { %1347 = vmatprep.subr.bf16.mxu0 %v1684_v40 }
  0xd7   :  { %1366 = vmatpush3.bf16.msra.mxu1 %v1482_v51 }
  0xd8   :  { %1367 = vmatprep.subr.bf16.mxu1 %v1684_v40 }
  0xd9   :  { %1348 = vmatpush3.bf16.msra.mxu0 %v1475_v44 }
  0xda   :  { %1349 = vmatprep.subr.bf16.mxu0 %v1684_v40 }
  0xdb   :  { %1368 = vmatpush3.bf16.msra.mxu1 %v1483_v52 }
  0xdc   :  { %1369 = vmatprep.subr.bf16.mxu1 %v1684_v40 }
  0xdd   :  { %1350 = vmatpush3.bf16.msra.mxu0 %v1476_v45 }
  0xde   :  { %1351 = vmatprep.subr.bf16.mxu0 %v1684_v40 }
  0xdf   :  { %1370 = vmatpush3.bf16.msra.mxu1 %v1484_v16 }
  0xe0   :  { %1371 = vmatprep.subr.bf16.mxu1 %v1684_v40 }
  0xe1   :  { %1352 = vmatpush3.bf16.msra.mxu0 %v1477_v46 }
  0xe3   :  { %1372 = vmatpush3.bf16.msra.mxu1 %v1485_v17 }
 0x177   :  { %v1247_v53 = vpop.f32.mrb[0].mxu0 }
 0x178   :  { %v1269_v54 = vpop.f32.mrb[0].mxu1  ;;  %v1248_v56 = vpop.f32.mrb[1].mxu0 }
 0x179   :  { %v1249_v57 = vadd.f32 %v1248_v56, %v1247_v53  ;;  %v1270_v58 = vpop.f32.mrb[1].mxu1  ;;  %v1250_v59 = vpop.f32.mrb[2].mxu0 }
 0x17a   :  { %v1271_v60 = vadd.f32 %v1270_v58, %v1269_v54  ;;  %v1272_v61 = vpop.f32.mrb[2].mxu1  ;;  %v1251_v62 = vpop.f32.mrb[3].mxu0 }
 0x17b   :  { %v775_v63 = vadd.f32 %v1249_v57, %v1148_v55  ;;  %v1273_v0 = vpop.f32.mrb[3].mxu1 }
 0x17d   :  { %v815_v1 = vadd.f32 %v1271_v60, %v775_v63 }
 0x197   :  { %v1291_v2 = vpop.f32.mrb[4].mxu0 }
 0x198   :  { %v1313_v3 = vpop.f32.mrb[4].mxu1  ;;  %v1292_v4 = vpop.f32.mrb[5].mxu0 }
 0x199   :  { %v1293_v5 = vadd.f32 %v1292_v4, %v1291_v2  ;;  %v1314_v6 = vpop.f32.mrb[5].mxu1  ;;  %v1294_v7 = vpop.f32.mrb[6].mxu0 }
 0x19a   :  { %v1315_v8 = vadd.f32 %v1314_v6, %v1313_v3  ;;  %v1316_v9 = vpop.f32.mrb[6].mxu1  ;;  %v1295_v10 = vpop.f32.mrb[7].mxu0 }
 0x19b   :  { %v855_v11 = vadd.f32 %v1293_v5, %v815_v1  ;;  %v1317_v12 = vpop.f32.mrb[7].mxu1 }
 0x19d   :  { %v895_v13 = vadd.f32 %v1315_v8, %v855_v11 }
 0x19f   :  { %v900_v14 = vmax.f32 %v895_v13, 0.0 }
 0x1a1   :  { %v901_v15 = vpack.c.bf16 %v900_v14, %v900_v14 }
 0x1a3   :  { %1354 = vmatmul.mubr.bf16.vlgmr.msra.gmra.mrb[8].mxu0 %v901_v15 }
 0x276   :  { %v1007_v19 = vpop.f32.mrb[8].mxu0 }
 0x277   :  { %v1008_v20 = vadd.f32 %v1213_v18, %v1007_v19  ;;  %v1355_v21 = vpop.f32.mrb[9].mxu0 }
 0x278   :  { %v1010_v22 = vpop.f32.mrb[10].mxu0 }
 0x279   :  { %v1013_v23 = vmax.f32 %v1008_v20, 0.0  ;;  %v1356_v24 = vpop.f32.mrb[11].mxu0 }
 0x27b   :  { %v1014_v25 = vpack.c.bf16 %v1013_v23, %v1013_v23 }
 0x27d   :  { %1374 = vmatmul.mubr.bf16.vlgmr.msra.gmra.mrb[8].mxu1 %v1014_v25 }
 0x350   :  { %v1120_v27 = vpop.f32.mrb[8].mxu1 }
 0x351   :  { %v1121_v28 = vadd.f32 %v1222_v26, %v1120_v27  ;;  %v1375_v29 = vpop.f32.mrb[9].mxu1 }
 0x352   :  { %v1123_v30 = vpop.f32.mrb[10].mxu1 }
 0x353   :  { %v1126_v31 = vmax.f32 %v1121_v28, 0.0  ;;  %v1376_v32 = vpop.f32.mrb[11].mxu1 }
 0x355   :  { %1127 = vst [vmem:[#allocation14] sm:$0xff] %v1126_v31 }
 0x356   :  { %1132 = vsyncadd [#allocation4], 96  ;;  %s1686_s6 = smov [#allocation14]  }
 0x357   :  { %s1133_s15 = sshll.u32 %s1686_s6, 4  ;;  %s1134_s15 = int_to_ptr.vmem [resolvable:$true] %s1133_s15 }
 0x358   :  { %s1640_s0 = scalar_lea.vmem %s1134_s15, 32  ;;  %s1644_s16 = scalar_lea.vmem %s1134_s15, 128 }
 0x359   :  { %p1641_p0 = scmp.ne.s32.totalorder %s1134_s15, %s1640_s0  ;;  %p1645_p1 = scmp.lt.s32.totalorder %s1134_s15, %s1134_s15 }
 0x35a   :  { %p1646_p2 = scmp.lt.s32.totalorder %s1644_s16, %s1640_s0 }
 0x35c   :  { %p1647_p3 = por %p1646_p2, %p1645_p1 }
 0x35e   :  { %p1648_p4 = pnand %p1647_p3, %p1641_p0 }
 0x360   :  { %1651 = shalt.err (!%p1648_p4)
}
 0x361   :  { %s1652_s20 = scalar_lea.hbm %s1869_s7, 32 }
 0x362   :  { %p1653_p5 = scmp.ne.s32.totalorder %s1869_s7, %s1652_s20  ;;  %p1656_p6 = scmp.lt.u32.totalorder %s1652_s20, %s1869_s7 }
 0x364   :  { %p1658_p7 = pnand %p1656_p6, %p1653_p5 }
 0x366   :  { %1661 = shalt.err (!%p1658_p7)
}
 0x367   :  { %s1687_s26 = smov 32   ;;  %s1688_s1 = smov 2  }
 0x368   :  { %1139 = dma.vmem_to_hbm [thread:$0]  %s1134_s15, 32, %s1869_s7, [#allocation4], %s1687_s26, %s1687_s26, %s1688_s1  }
 0x369   :  { %1670 = dma.done.wait [#allocation4], 128  }
 0x36a   :  { %1671 = vsyncadd [#allocation4], 4294967168 }
 0x36b   :  { %1143 = vsyncpa [#allocation3], 1 }
 0x36c   :  { %1144 = vsyncpa [#allocation6], 1 }
 0x36d   :  { %1145 = vsyncpa [#allocation9], 1 }
 0x36e   :  { %1146 = vsyncpa [#allocation12], 1 }
 0x36f   :  { %1147 = vsyncpa [#allocation4], 1 }

</bundles_post_ra>
